<compile_context>
chip_gen: v5e
topology: v5e:2x2
jax: 0.10.0
libtpu: 0.0.40
codegen_flags: <defaults>
</compile_context>

<pallas_src>
import math

import jax
import jax.numpy as jnp
from jax.experimental import pallas as pl
from jax.experimental.pallas import tpu as pltpu

BN_EPS = 1e-5
_LANE = 128
_SUBLANE = 8


def _round_up(x, m):
    return ((x + m - 1) // m) * m


# ----------------------------------------------------------------------------
# Parameter construction (matches the PyTorch module's shapes / default init).
# ----------------------------------------------------------------------------
def init_params(key, in_feature, hidden_sizes, output_dim=2, dtype=jnp.float32):
    sizes = [in_feature, *hidden_sizes, output_dim]
    params = []
    for i in range(len(sizes) - 1):
        fan_in, fan_out = sizes[i], sizes[i + 1]
        key, kw, kb = jax.random.split(key, 3)
        bound = 1.0 / math.sqrt(fan_in)
        # PyTorch Linear stores weight as (out, in).
        w = jax.random.uniform(kw, (fan_out, fan_in), dtype, -bound, bound)
        b = jax.random.uniform(kb, (fan_out,), dtype, -bound, bound)
        layer = {"w": w, "b": b}
        if i < len(sizes) - 2:  # hidden layers carry BatchNorm1d affine params
            layer["gamma"] = jnp.ones((fan_out,), dtype)
            layer["beta"] = jnp.zeros((fan_out,), dtype)
        params.append(layer)
    return params


# ----------------------------------------------------------------------------
# One-time packing of all parameters into two padded VMEM-friendly slabs.
# ----------------------------------------------------------------------------
def pack_params(params, in_feature):
    num_hidden = len(params) - 1

    # Padded contraction (K) and output (N) dims per layer.  Each layer's K
    # equals the previous layer's padded N, so activations flow with no
    # reshapes; zero padding keeps the padded columns exactly zero throughout.
    k_pads, n_pads = [], []
    k = _round_up(in_feature, _SUBLANE)
    for layer in params:
        n_pad = _round_up(layer["w"].shape[0], _LANE)
        k_pads.append(k)
        n_pads.append(n_pad)
        k = n_pad
    max_n = max(n_pads)

    # Weight slab: layer i's transposed (in, out) weight sits at rows
    # [row_offs[i], row_offs[i]+in_i), columns [0, out_i).  Offsets are
    # sublane (8) aligned by construction.
    row_offs, off = [], 0
    for kp in k_pads:
        row_offs.append(off)
        off += kp
    w_slab = jnp.zeros((off, max_n), jnp.float32)
    for i, layer in enumerate(params):
        w_t = jnp.asarray(layer["w"], jnp.float32).T  # (in, out)
        kin, nout = w_t.shape
        w_slab = w_slab.at[row_offs[i]:row_offs[i] + kin, :nout].set(w_t)

    # Vector slab: gamma_i, beta_i per hidden layer, then the final bias.
    # Each vector gets its own 8-row (sublane-aligned) stripe.
    # Hidden-layer biases are intentionally NOT packed: BN cancels them.
    n_vecs = 2 * num_hidden + 1
    v_slab = jnp.zeros((n_vecs * _SUBLANE, max_n), jnp.float32)
    for i in range(num_hidden):
        g = jnp.asarray(params[i]["gamma"], jnp.float32)
        bt = jnp.asarray(params[i]["beta"], jnp.float32)
        v_slab = v_slab.at[(2 * i) * _SUBLANE, :g.shape[0]].set(g)
        v_slab = v_slab.at[(2 * i + 1) * _SUBLANE, :bt.shape[0]].set(bt)
    b_last = jnp.asarray(params[-1]["b"], jnp.float32)
    v_slab = v_slab.at[(2 * num_hidden) * _SUBLANE, :b_last.shape[0]].set(b_last)

    meta = dict(
        num_hidden=num_hidden,
        k_pads=tuple(k_pads),
        n_pads=tuple(n_pads),
        row_offs=tuple(row_offs),
        in_pad=k_pads[0],
        out_dim=int(params[-1]["w"].shape[0]),
    )
    return w_slab, v_slab, meta


# ----------------------------------------------------------------------------
# Fused kernel: all matmuls, folded BatchNorm (batch stats) and ReLU in VMEM.
# ----------------------------------------------------------------------------
def _make_kernel(meta):
    num_hidden = meta["num_hidden"]
    k_pads = meta["k_pads"]
    n_pads = meta["n_pads"]
    row_offs = meta["row_offs"]

    def kernel(x_ref, w_ref, v_ref, o_ref):
        inv_b = 1.0 / x_ref.shape[0]
        h = x_ref[...]

        for i in range(num_hidden):
            r0, kp, npd = row_offs[i], k_pads[i], n_pads[i]
            w = w_ref[r0:r0 + kp, :npd]
            # Hidden bias dropped: BN's mean subtraction cancels it exactly.
            h = jnp.dot(h, w, preferred_element_type=jnp.float32)

            # Single-pass batch statistics (biased variance, PyTorch training BN).
            s = jnp.sum(h, axis=0, keepdims=True)
            ss = jnp.sum(h * h, axis=0, keepdims=True)
            mean = s * inv_b
            var = ss * inv_b - mean * mean
            inv_std = jax.lax.rsqrt(var + BN_EPS)

            g_row = (2 * i) * _SUBLANE
            b_row = (2 * i + 1) * _SUBLANE
            gamma = v_ref[g_row:g_row + 1, :npd]
            beta = v_ref[b_row:b_row + 1, :npd]

            # Folded BN affine + ReLU: 2 VALU ops/elem + max.
            scale = gamma * inv_std
            shift = beta - mean * scale
            h = jnp.maximum(h * scale + shift, 0.0)

        r0, kp, npd = row_offs[-1], k_pads[-1], n_pads[-1]
        w = w_ref[r0:r0 + kp, :npd]
        bl_row = (2 * num_hidden) * _SUBLANE
        b_last = v_ref[bl_row:bl_row + 1, :npd]
        out = jnp.dot(h, w, preferred_element_type=jnp.float32) + b_last
        o_ref[...] = out.astype(o_ref.dtype)

    return kernel


# ----------------------------------------------------------------------------
# Forward wrapper: params packed once, per-call path fully jitted.
# ----------------------------------------------------------------------------
def make_forward(params, in_feature):
    w_slab, v_slab, meta = pack_params(params, in_feature)
    kernel = _make_kernel(meta)
    in_pad = meta["in_pad"]
    n_pad_last = meta["n_pads"][-1]
    out_dim = meta["out_dim"]
    k_pads, n_pads = meta["k_pads"], meta["n_pads"]

    @jax.jit
    def forward(x):
        b = x.shape[0]  # static under jit
        xf = x.astype(jnp.float32)
        if xf.shape[1] != in_pad:
            xf = jnp.pad(xf, ((0, 0), (0, in_pad - xf.shape[1])))

        flops = 2 * b * sum(k * n for k, n in zip(k_pads, n_pads)) \
            + 8 * b * sum(n_pads[:-1])
        transcendentals = sum(n_pads[:-1])  # one rsqrt per BN feature
        bytes_accessed = 4 * (xf.size + w_slab.size + v_slab.size + b * n_pad_last)

        vmem = pl.BlockSpec(memory_space=pltpu.MemorySpace.VMEM)
        out = pl.pallas_call(
            kernel,
            out_shape=jax.ShapeDtypeStruct((b, n_pad_last), jnp.float32),
            in_specs=[vmem, vmem, vmem],
            out_specs=vmem,
            cost_estimate=pl.CostEstimate(
                flops=flops,
                transcendentals=transcendentals,
                bytes_accessed=bytes_accessed,
            ),
        )(xf, w_slab, v_slab)
        # Kernel output is a lane-dense 128-wide slab; take the real logits.
        return out[:, :out_dim]

    return forward


# ----------------------------------------------------------------------------
# Pure-JAX reference with the exact PyTorch semantics (bias + two-pass BN).
# ----------------------------------------------------------------------------
def reference_forward(x, params):
    h = x.astype(jnp.float32)
    num_hidden = len(params) - 1
    for i, layer in enumerate(params):
        h = h @ layer["w"].T + layer["b"]
        if i < num_hidden:
            mean = jnp.mean(h, axis=0, keepdims=True)
            var = jnp.mean((h - mean) ** 2, axis=0, keepdims=True)
            h = (h - mean) / jnp.sqrt(var + BN_EPS)
            h = h * layer["gamma"] + layer["beta"]
            h = jnp.maximum(h, 0.0)
    return h


if __name__ == "__main__":
    key = jax.random.PRNGKey(0)
    k_params, k_x = jax.random.split(key)

    batch = 8
    in_feature = 16
    hidden_sizes = [32, 32]
    output_dim = 2

    params = init_params(k_params, in_feature, hidden_sizes, output_dim)
    x = jax.random.normal(k_x, (batch, in_feature), jnp.float32)

    forward = make_forward(params, in_feature)
    out = jax.block_until_ready(forward(x))

    ref = reference_forward(x, params)
    assert out.shape == (batch, output_dim), out.shape
    assert jnp.allclose(out, ref, atol=2e-4, rtol=2e-4), (
        f"max abs diff = {jnp.max(jnp.abs(out - ref))}"
    )
    print("KERNEL_OK")
</pallas_src>

<mosaic_0001>
module attributes {stable_mosaic.version = 11 : i64} {
  func.func @kernel(%arg0: memref<8x16xf32, #tpu.memory_space<vmem>>, %arg1: memref<272x128xf32, #tpu.memory_space<vmem>>, %arg2: memref<40x128xf32, #tpu.memory_space<vmem>>, %arg3: memref<8x128xf32, #tpu.memory_space<vmem>>) attributes {dimension_semantics = [], scalar_prefetch = 0 : i64, scratch_operands = 0 : i64, tpu.core_type = #tpu.core_type<tc>} {
    %c0 = arith.constant 0 : index
    %c0_0 = arith.constant 0 : index
    %0 = vector.load %arg0[%c0, %c0_0] : memref<8x16xf32, #tpu.memory_space<vmem>>, vector<8x16xf32>
    %c0_1 = arith.constant 0 : index
    %c0_2 = arith.constant 0 : index
    %1 = vector.load %arg1[%c0_1, %c0_2] : memref<272x128xf32, #tpu.memory_space<vmem>>, vector<16x128xf32>
    %cst = arith.constant dense<0.000000e+00> : vector<8x128xf32>
    %2 = tpu.matmul %0, %1, %cst {dimension_numbers = #tpu.dot_dimension_numbers<[1], [0], [0], [1], [0, 0, 1, 1], [], []>} : vector<8x16xf32>, vector<16x128xf32>, vector<8x128xf32> -> vector<8x128xf32>
    %cst_3 = arith.constant dense<0.000000e+00> : vector<128xf32>
    %3 = vector.multi_reduction <add>, %2, %cst_3 [0] : vector<8x128xf32> to vector<128xf32>
    %4 = vector.shape_cast %3 : vector<128xf32> to vector<1x128xf32>
    %5 = arith.mulf %2, %2 : vector<8x128xf32>
    %cst_4 = arith.constant dense<0.000000e+00> : vector<128xf32>
    %6 = vector.multi_reduction <add>, %5, %cst_4 [0] : vector<8x128xf32> to vector<128xf32>
    %7 = vector.shape_cast %6 : vector<128xf32> to vector<1x128xf32>
    %cst_5 = arith.constant 1.250000e-01 : f32
    %8 = vector.broadcast %cst_5 : f32 to vector<1x128xf32>
    %9 = arith.mulf %4, %8 : vector<1x128xf32>
    %cst_6 = arith.constant 1.250000e-01 : f32
    %10 = vector.broadcast %cst_6 : f32 to vector<1x128xf32>
    %11 = arith.mulf %7, %10 : vector<1x128xf32>
    %12 = arith.mulf %9, %9 : vector<1x128xf32>
    %13 = arith.subf %11, %12 : vector<1x128xf32>
    %cst_7 = arith.constant 9.99999974E-6 : f32
    %14 = vector.broadcast %cst_7 : f32 to vector<1x128xf32>
    %15 = arith.addf %13, %14 : vector<1x128xf32>
    %16 = math.rsqrt %15 : vector<1x128xf32>
    %c0_8 = arith.constant 0 : index
    %c0_9 = arith.constant 0 : index
    %17 = vector.load %arg2[%c0_8, %c0_9] : memref<40x128xf32, #tpu.memory_space<vmem>>, vector<1x128xf32>
    %c8 = arith.constant 8 : index
    %c0_10 = arith.constant 0 : index
    %18 = vector.load %arg2[%c8, %c0_10] : memref<40x128xf32, #tpu.memory_space<vmem>>, vector<1x128xf32>
    %19 = arith.mulf %17, %16 : vector<1x128xf32>
    %20 = arith.mulf %9, %19 : vector<1x128xf32>
    %21 = arith.subf %18, %20 : vector<1x128xf32>
    %22 = vector.broadcast %19 : vector<1x128xf32> to vector<8x128xf32>
    %23 = arith.mulf %2, %22 : vector<8x128xf32>
    %24 = vector.broadcast %21 : vector<1x128xf32> to vector<8x128xf32>
    %25 = arith.addf %23, %24 : vector<8x128xf32>
    %cst_11 = arith.constant 0.000000e+00 : f32
    %26 = vector.broadcast %cst_11 : f32 to vector<8x128xf32>
    %27 = arith.maximumf %25, %26 : vector<8x128xf32>
    %c16 = arith.constant 16 : index
    %c0_12 = arith.constant 0 : index
    %28 = vector.load %arg1[%c16, %c0_12] : memref<272x128xf32, #tpu.memory_space<vmem>>, vector<128x128xf32>
    %cst_13 = arith.constant dense<0.000000e+00> : vector<8x128xf32>
    %29 = tpu.matmul %27, %28, %cst_13 {dimension_numbers = #tpu.dot_dimension_numbers<[1], [0], [0], [1], [0, 0, 1, 1], [], []>} : vector<8x128xf32>, vector<128x128xf32>, vector<8x128xf32> -> vector<8x128xf32>
    %cst_14 = arith.constant dense<0.000000e+00> : vector<128xf32>
    %30 = vector.multi_reduction <add>, %29, %cst_14 [0] : vector<8x128xf32> to vector<128xf32>
    %31 = vector.shape_cast %30 : vector<128xf32> to vector<1x128xf32>
    %32 = arith.mulf %29, %29 : vector<8x128xf32>
    %cst_15 = arith.constant dense<0.000000e+00> : vector<128xf32>
    %33 = vector.multi_reduction <add>, %32, %cst_15 [0] : vector<8x128xf32> to vector<128xf32>
    %34 = vector.shape_cast %33 : vector<128xf32> to vector<1x128xf32>
    %cst_16 = arith.constant 1.250000e-01 : f32
    %35 = vector.broadcast %cst_16 : f32 to vector<1x128xf32>
    %36 = arith.mulf %31, %35 : vector<1x128xf32>
    %cst_17 = arith.constant 1.250000e-01 : f32
    %37 = vector.broadcast %cst_17 : f32 to vector<1x128xf32>
    %38 = arith.mulf %34, %37 : vector<1x128xf32>
    %39 = arith.mulf %36, %36 : vector<1x128xf32>
    %40 = arith.subf %38, %39 : vector<1x128xf32>
    %cst_18 = arith.constant 9.99999974E-6 : f32
    %41 = vector.broadcast %cst_18 : f32 to vector<1x128xf32>
    %42 = arith.addf %40, %41 : vector<1x128xf32>
    %43 = math.rsqrt %42 : vector<1x128xf32>
    %c16_19 = arith.constant 16 : index
    %c0_20 = arith.constant 0 : index
    %44 = vector.load %arg2[%c16_19, %c0_20] : memref<40x128xf32, #tpu.memory_space<vmem>>, vector<1x128xf32>
    %c24 = arith.constant 24 : index
    %c0_21 = arith.constant 0 : index
    %45 = vector.load %arg2[%c24, %c0_21] : memref<40x128xf32, #tpu.memory_space<vmem>>, vector<1x128xf32>
    %46 = arith.mulf %44, %43 : vector<1x128xf32>
    %47 = arith.mulf %36, %46 : vector<1x128xf32>
    %48 = arith.subf %45, %47 : vector<1x128xf32>
    %49 = vector.broadcast %46 : vector<1x128xf32> to vector<8x128xf32>
    %50 = arith.mulf %29, %49 : vector<8x128xf32>
    %51 = vector.broadcast %48 : vector<1x128xf32> to vector<8x128xf32>
    %52 = arith.addf %50, %51 : vector<8x128xf32>
    %cst_22 = arith.constant 0.000000e+00 : f32
    %53 = vector.broadcast %cst_22 : f32 to vector<8x128xf32>
    %54 = arith.maximumf %52, %53 : vector<8x128xf32>
    %c144 = arith.constant 144 : index
    %c0_23 = arith.constant 0 : index
    %55 = vector.load %arg1[%c144, %c0_23] : memref<272x128xf32, #tpu.memory_space<vmem>>, vector<128x128xf32>
    %c32 = arith.constant 32 : index
    %c0_24 = arith.constant 0 : index
    %56 = vector.load %arg2[%c32, %c0_24] : memref<40x128xf32, #tpu.memory_space<vmem>>, vector<1x128xf32>
    %cst_25 = arith.constant dense<0.000000e+00> : vector<8x128xf32>
    %57 = tpu.matmul %54, %55, %cst_25 {dimension_numbers = #tpu.dot_dimension_numbers<[1], [0], [0], [1], [0, 0, 1, 1], [], []>} : vector<8x128xf32>, vector<128x128xf32>, vector<8x128xf32> -> vector<8x128xf32>
    %58 = vector.broadcast %56 : vector<1x128xf32> to vector<8x128xf32>
    %59 = arith.addf %57, %58 : vector<8x128xf32>
    %c0_26 = arith.constant 0 : index
    %c0_27 = arith.constant 0 : index
    %60 = vector.load %arg3[%c0_26, %c0_27] : memref<8x128xf32, #tpu.memory_space<vmem>>, vector<8x128xf32>
    tpu.vector_store %arg3[%c0_26, %c0_27], %59 {strides = array<i32>} : memref<8x128xf32, #tpu.memory_space<vmem>>, vector<8x128xf32>,
    return
  }
}

</mosaic_0001>

<bundles_post_ra>
// kernel: forward.1
= control target key start
LH: loop header
LB: loop body
LE: loop exit
PB: predicated region body
PF: predicated region fallthrough
CT: control target
= control target key end

     0   :  { %8 = vsyncpa [#allocation3], 0  ;;  %s367_s0 = inlined_call_operand.hbm [shape: f32[8,16], index: 0, kind: input, shape index: {}]   ;;  %s368_s1 = inlined_call_operand.hbm [shape: f32[272,128], index: 1, kind: input, shape index: {}]   ;;  %s369_s2 = inlined_call_operand.hbm [shape: f32[40,128], index: 2, kind: input, shape index: {}]   ;;  %s370_s3 = inlined_call_operand.vmem [shape: f32[8,128], index: 3, kind: output, shape index: {}]  }
   0x1   :  { %9 = vsyncpa [#allocation5], 0  ;;  %s25_s14 = sshll.u32 %s368_s1, 4  ;;  %s330_s15 = smov [#allocation4]   ;;  %s26_s14 = int_to_ptr.hbm [resolvable:$true] %s25_s14 }
   0x2   :  { %s27_s16 = sshll.u32 %s330_s15, 4  ;;  %s15_s19 = sshll.u32 %s367_s0, 4  ;;  %s28_s16 = int_to_ptr.vmem [resolvable:$true] %s27_s16  ;;  %s16_s19 = int_to_ptr.hbm [resolvable:$true] %s15_s19 }
   0x3   :  { %s331_s20 = smov 128   ;;  %s332_s21 = smov 8  }
   0x4   :  { %33 = dma.hbm_to_vmem [thread:$0]  %s26_s14, 4352, %s28_s16, [#allocation5], %s331_s20, %s331_s20, %s332_s21  }
   0x5   :  { %s333_s22 = smov [#allocation2]   ;;  %s38_s26 = sshll.u32 %s369_s2, 4  ;;  %s39_s26 = int_to_ptr.hbm [resolvable:$true] %s38_s26 }
   0x6   :  { %s17_s23 = sshll.u32 %s333_s22, 4  ;;  %s334_s1 = smov [#allocation6]   ;;  %s18_s23 = int_to_ptr.vmem [resolvable:$true] %s17_s23 }
   0x7   :  { %20 = dma.hbm_to_vmem [thread:$0]  %s16_s19, 128, %s18_s23, [#allocation3]  }
   0x8   :  { %s40_s27 = sshll.u32 %s334_s1, 4  ;;  %s41_s27 = int_to_ptr.vmem [resolvable:$true] %s40_s27 }
   0x9   :  { %46 = dma.hbm_to_vmem [thread:$0]  %s39_s26, 640, %s41_s27, [#allocation5], %s331_s20, %s331_s20, %s332_s21  }
   0xa   :  { %326 = dma.done.wait [#allocation3], 128  }
   0xb   :  { %327 = vsyncadd [#allocation3], 4294967168 }
   0xc   :  { %328 = dma.done.wait [#allocation5], 4992  }
   0xd   :  { %329 = vsyncadd [#allocation5], 4294962304  ;;  %v61_v0 = vld [vmem:[#allocation4 + $0x8] sm:$0xff]  ;;  %v60_v1 = vld [vmem:[#allocation4] sm:$0xff]  ;;  %vm62_vm0 = vcmask 130048  }
   0xe   :  { %80 = vmatpush.msra.mxu0 %v61_v0  ;;  %v59_v2 = vld [vmem:[#allocation2] sm:$0xff]  ;;  %v139_v3 = vld [vmem:[#allocation4 + $0x88] sm:$0xff]  ;;  %v138_v4 = vld [vmem:[#allocation4 + $0x80] sm:$0xff] }
   0xf   :  { %140 = vmatpush.msra.mxu1 %v139_v3  ;;  %v137_v5 = vld [vmem:[#allocation4 + $0x78] sm:$0xff]  ;;  %v136_v6 = vld [vmem:[#allocation4 + $0x70] sm:$0xff]  ;;  %v135_v7 = vld [vmem:[#allocation4 + $0x68] sm:$0xff] }
  0x10   :  { %81 = vmatpush.msra.mxu0 %v60_v1  ;;  %v134_v8 = vld [vmem:[#allocation4 + $0x60] sm:$0xff]  ;;  %v133_v9 = vld [vmem:[#allocation4 + $0x58] sm:$0xff]  ;;  %v132_v13 = vld [vmem:[#allocation4 + $0x50] sm:$0xff] }
  0x11   :  { %243 = vmatmul.msk.f32.vlgmr.msra.gmra.mxu0 %vm62_vm0, %v59_v2  ;;  %141 = vmatpush.msra.mxu1 %v138_v4  ;;  %v131_v16 = vld [vmem:[#allocation4 + $0x48] sm:$0xff]  ;;  %v130_v19 = vld [vmem:[#allocation4 + $0x40] sm:$0xff]  ;;  %v129_v22 = vld [vmem:[#allocation4 + $0x38] sm:$0xff] }
  0x12   :  { %v128_v25 = vld [vmem:[#allocation4 + $0x30] sm:$0xff]  ;;  %v127_v28 = vld [vmem:[#allocation4 + $0x28] sm:$0xff]  ;;  %v126_v29 = vld [vmem:[#allocation4 + $0x20] sm:$0xff] }
  0x13   :  { %142 = vmatpush.msra.mxu1 %v137_v5  ;;  %v125_v32 = vld [vmem:[#allocation4 + $0x18] sm:$0xff]  ;;  %v124_v35 = vld [vmem:[#allocation4 + $0x10] sm:$0xff]  ;;  %v213_v55 = vld [vmem:[#allocation4 + $0x108] sm:$0xff] }
  0x14   :  { %v114_v44 = vld [vmem:[#allocation6] sm:$0x1]  ;;  %v115_v47 = vld [vmem:[#allocation6 + $0x8] sm:$0x1]  ;;  %216 = vmatpush.msra.mxu2 %v213_v55  ;;  %v212_v56 = vld [vmem:[#allocation4 + $0x100] sm:$0xff] }
  0x15   :  { %143 = vmatpush.msra.mxu1 %v136_v6  ;;  %v211_v57 = vld [vmem:[#allocation4 + $0xf8] sm:$0xff]  ;;  %v210_v58 = vld [vmem:[#allocation4 + $0xf0] sm:$0xff]  ;;  %v209_v59 = vld [vmem:[#allocation4 + $0xe8] sm:$0xff] }
  0x16   :  { %217 = vmatpush.msra.mxu2 %v212_v56  ;;  %v208_v60 = vld [vmem:[#allocation4 + $0xe0] sm:$0xff]  ;;  %v207_v61 = vld [vmem:[#allocation4 + $0xd8] sm:$0xff]  ;;  %v206_v1 = vld [vmem:[#allocation4 + $0xd0] sm:$0xff] }
  0x17   :  { %144 = vmatpush.msra.mxu1 %v135_v7  ;;  %v205_v4 = vld [vmem:[#allocation4 + $0xc8] sm:$0xff]  ;;  %v204_v7 = vld [vmem:[#allocation4 + $0xc0] sm:$0xff] }
  0x18   :  { %218 = vmatpush.msra.mxu2 %v211_v57 }
  0x19   :  { %145 = vmatpush.msra.mxu1 %v134_v8 }
  0x1a   :  { %219 = vmatpush.msra.mxu2 %v210_v58 }
  0x1b   :  { %146 = vmatpush.msra.mxu1 %v133_v9 }
  0x1c   :  { %220 = vmatpush.msra.mxu2 %v209_v59 }
  0x1d   :  { %147 = vmatpush.msra.mxu1 %v132_v13  ;;  %v202_v13 = vld [vmem:[#allocation4 + $0xb0] sm:$0xff] }
  0x1e   :  { %221 = vmatpush.msra.mxu2 %v208_v60 }
  0x1f   :  { %148 = vmatpush.msra.mxu1 %v131_v16  ;;  %v201_v16 = vld [vmem:[#allocation4 + $0xa8] sm:$0xff] }
  0x20   :  { %222 = vmatpush.msra.mxu2 %v207_v61 }
  0x21   :  { %149 = vmatpush.msra.mxu1 %v130_v19 }
  0x22   :  { %223 = vmatpush.msra.mxu2 %v206_v1 }
  0x23   :  { %150 = vmatpush.msra.mxu1 %v129_v22 }
  0x24   :  { %224 = vmatpush.msra.mxu2 %v205_v4 }
  0x25   :  { %151 = vmatpush.msra.mxu1 %v128_v25 }
  0x26   :  { %225 = vmatpush.msra.mxu2 %v204_v7 }
  0x27   :  { %152 = vmatpush.msra.mxu1 %v127_v28 }
  0x29   :  { %153 = vmatpush.msra.mxu1 %v126_v29 }
  0x2b   :  { %154 = vmatpush.msra.mxu1 %v125_v32  ;;  %v188_v32 = vld [vmem:[#allocation6 + $0x10] sm:$0x1] }
  0x2d   :  { %155 = vmatpush.msra.mxu1 %v124_v35  ;;  %v189_v35 = vld [vmem:[#allocation6 + $0x18] sm:$0x1] }
  0x8e   :  { %v83_v10 = vpop.f32.mrf.mxu0 }
  0x8f   :  { %v86_v11 = vrot.slane %v83_v10, 4  ;;  %v92_v12 = vmul.f32 %v83_v10, %v83_v10 }
  0x91   :  { %v87_v14 = vadd.f32 %v86_v11, %v83_v10  ;;  %v93_v15 = vrot.slane %v92_v12, 4 }
  0x93   :  { %v88_v17 = vrot.slane %v87_v14, 2  ;;  %v94_v18 = vadd.f32 %v93_v15, %v92_v12 }
  0x95   :  { %v89_v20 = vadd.f32 %v88_v17, %v87_v14  ;;  %v95_v21 = vrot.slane %v94_v18, 2  ;;  %v200_v17 = vld [vmem:[#allocation4 + $0xa0] sm:$0xff] }
  0x97   :  { %v90_v23 = vrot.slane %v89_v20, 1  ;;  %v96_v24 = vadd.f32 %v95_v21, %v94_v18 }
  0x99   :  { %v91_v26 = vadd.f32 %v90_v23, %v89_v20  ;;  %v97_v27 = vrot.slane %v96_v24, 1  ;;  %v199_v20 = vld [vmem:[#allocation4 + $0x98] sm:$0xff]  ;;  %v198_v23 = vld [vmem:[#allocation4 + $0x90] sm:$0xff] }
  0x9b   :  { %v98_v30 = vadd.f32 %v97_v27, %v96_v24  ;;  %v99_v31 = vmul.f32 0.125, %v91_v26 }
  0x9d   :  { %v100_v33 = vmul.f32 0.125, %v98_v30  ;;  %v101_v34 = vmul.f32 %v99_v31, %v99_v31 }
  0x9f   :  { %v102_v36 = vsub.f32 %v100_v33, %v101_v34 }
  0xa1   :  { %v103_v37 = vadd.f32 1e-05, %v102_v36 }
  0xa3   :  { %250 = vrsqrt.f32 %v103_v37  ;;  %vm110_vm2 = vweird.f32 %v103_v37 }
  0xa9   :  { %v251_v38 = vpop.eup %250 }
  0xaa   :  { %v105_v39 = vmul.f32 %v251_v38, %v103_v37  ;;  %vm111_vm1 = vweird.f32 %v251_v38 }
  0xab   :  { %vm112_vm3 = vmor %vm110_vm2, %vm111_vm1 }
  0xac   :  { %v106_v40 = vmul.f32 %v251_v38, %v105_v39 }
  0xae   :  { %v107_v41 = vmul.f32 0.5, %v106_v40 }
  0xb0   :  { %v108_v42 = vsub.f32 1.5, %v107_v41 }
  0xb2   :  { %v109_v43 = vmul.f32 %v251_v38, %v108_v42 }
  0xb4   :  { %v113_v45 = vsel %vm112_vm3, %v251_v38, %v109_v43  ;;  %v249_v43 = vld [vmem:[#allocation6 + $0x20] ss:$0 sm:$0xff] }
  0xb5   :  { %v116_v46 = vmul.f32 %v114_v44, %v113_v45 }
  0xb7   :  { %v119_v48 = vperm.slane %v116_v46, 0  ;;  %v117_v49 = vmul.f32 %v116_v46, %v99_v31 }
  0xb9   :  { %v118_v50 = vsub.f32 %v115_v47, %v117_v49  ;;  %v120_v51 = vmul.f32 %v119_v48, %v83_v10  ;;  %v203_v10 = vld [vmem:[#allocation4 + $0xb8] sm:$0xff] }
  0xba   :  { %226 = vmatpush.msra.mxu2 %v203_v10 }
  0xbb   :  { %v121_v52 = vperm.slane %v118_v50, 0 }
  0xbc   :  { %227 = vmatpush.msra.mxu2 %v202_v13 }
  0xbd   :  { %v122_v53 = vadd.f32 %v121_v52, %v120_v51 }
  0xbe   :  { %228 = vmatpush.msra.mxu2 %v201_v16 }
  0xbf   :  { %v123_v54 = vmax.f32 %v122_v53, 0.0 }
  0xc0   :  { %229 = vmatpush.msra.mxu2 %v200_v17 }
  0xc1   :  { %156 = vmatmul.f32.vlgmr.msra.gmra.mxu1 %v123_v54 }
  0xc2   :  { %230 = vmatpush.msra.mxu2 %v199_v20 }
  0xc4   :  { %231 = vmatpush.msra.mxu2 %v198_v23 }
 0x13e   :  { %v157_v62 = vpop.f32.mrf.mxu1 }
 0x13f   :  { %v160_v63 = vrot.slane %v157_v62, 4  ;;  %v166_v0 = vmul.f32 %v157_v62, %v157_v62 }
 0x141   :  { %v161_v2 = vadd.f32 %v160_v63, %v157_v62  ;;  %v167_v3 = vrot.slane %v166_v0, 4 }
 0x143   :  { %v162_v5 = vrot.slane %v161_v2, 2  ;;  %v168_v6 = vadd.f32 %v167_v3, %v166_v0 }
 0x145   :  { %v163_v8 = vadd.f32 %v162_v5, %v161_v2  ;;  %v169_v9 = vrot.slane %v168_v6, 2 }
 0x147   :  { %v164_v11 = vrot.slane %v163_v8, 1  ;;  %v170_v12 = vadd.f32 %v169_v9, %v168_v6 }
 0x149   :  { %v165_v14 = vadd.f32 %v164_v11, %v163_v8  ;;  %v171_v15 = vrot.slane %v170_v12, 1 }
 0x14b   :  { %v172_v18 = vadd.f32 %v171_v15, %v170_v12  ;;  %v173_v19 = vmul.f32 0.125, %v165_v14 }
 0x14d   :  { %v174_v21 = vmul.f32 0.125, %v172_v18  ;;  %v175_v22 = vmul.f32 %v173_v19, %v173_v19 }
 0x14f   :  { %v176_v24 = vsub.f32 %v174_v21, %v175_v22 }
 0x151   :  { %v177_v25 = vadd.f32 1e-05, %v176_v24 }
 0x153   :  { %252 = vrsqrt.f32 %v177_v25  ;;  %vm184_vm5 = vweird.f32 %v177_v25 }
 0x159   :  { %v253_v26 = vpop.eup %252 }
 0x15a   :  { %v179_v27 = vmul.f32 %v253_v26, %v177_v25  ;;  %vm185_vm4 = vweird.f32 %v253_v26 }
 0x15b   :  { %vm186_vm6 = vmor %vm184_vm5, %vm185_vm4 }
 0x15c   :  { %v180_v28 = vmul.f32 %v253_v26, %v179_v27 }
 0x15e   :  { %v181_v29 = vmul.f32 0.5, %v180_v28 }
 0x160   :  { %v182_v30 = vsub.f32 1.5, %v181_v29 }
 0x162   :  { %v183_v31 = vmul.f32 %v253_v26, %v182_v30 }
 0x164   :  { %v187_v33 = vsel %vm186_vm6, %v253_v26, %v183_v31 }
 0x165   :  { %v190_v34 = vmul.f32 %v188_v32, %v187_v33 }
 0x167   :  { %v193_v36 = vperm.slane %v190_v34, 0  ;;  %v191_v37 = vmul.f32 %v190_v34, %v173_v19 }
 0x169   :  { %v192_v38 = vsub.f32 %v189_v35, %v191_v37  ;;  %v194_v39 = vmul.f32 %v193_v36, %v157_v62 }
 0x16b   :  { %v195_v40 = vperm.slane %v192_v38, 0 }
 0x16d   :  { %v196_v41 = vadd.f32 %v195_v40, %v194_v39 }
 0x16f   :  { %v197_v42 = vmax.f32 %v196_v41, 0.0 }
 0x171   :  { %232 = vmatmul.f32.vlgmr.msra.gmra.mxu2 %v197_v42 }
 0x1f4   :  { %v233_v44 = vpop.f32.mrf.mxu2 }
 0x1f5   :  { %v234_v45 = vadd.f32 %v249_v43, %v233_v44 }
 0x1f7   :  { %236 = vst [vmem:[%s370_s3] sm:$0xff] %v234_v45 }
 0x1f8   :  { %241 = vsyncpa [#allocation3], 1 }
 0x1f9   :  { %242 = vsyncpa [#allocation5], 1 }

</bundles_post_ra>
